<compile_context>
chip_gen: v7x
topology: tpu7x:2x2x1
jax: 0.10.0
libtpu: 0.0.40
codegen_flags: <defaults>
</compile_context>

<pallas_src>
import functools

import jax
import jax.numpy as jnp
from jax.experimental import pallas as pl
from jax.experimental.pallas import tpu as pltpu


# --------------------------------------------------------------------------
# Fused Pallas kernel
# --------------------------------------------------------------------------
def _conv3x3_one_matmul(rows, lhs_ref, w_ref, imgs, height):
    """Padding-1 3x3 conv of lane-dense rows as ONE bf16 MXU matmul.

    rows:    (imgs*height, W*C) f32 value, lane index = column*C + channel.
    lhs_ref: (imgs, height, 3*W*C) f32 VMEM scratch. Lane group g holds input
             row (i + g - 1); only the two halo row-slices are zeroed, every
             other element is written exactly once (no full zero fill).
    w_ref:   (3*W*C, W*Cout) bf16 stacked banded weight [T_kh0; T_kh1; T_kh2];
             W-boundary (left/right) zero padding is folded into the bands.
    """
    nh, wc = rows.shape
    r3 = rows.reshape(imgs, height, wc)
    zrow = jnp.zeros((imgs, 1, wc), jnp.float32)

    # group 0: x[i-1]  (zero halo at the top of each image)
    lhs_ref[:, 0:1, 0:wc] = zrow
    lhs_ref[:, 1:height, 0:wc] = r3[:, 0:height - 1, :]
    # group 1: x[i]
    lhs_ref[:, :, wc:2 * wc] = r3
    # group 2: x[i+1]  (zero halo at the bottom of each image)
    lhs_ref[:, 0:height - 1, 2 * wc:3 * wc] = r3[:, 1:, :]
    lhs_ref[:, height - 1:height, 2 * wc:3 * wc] = zrow

    lhs = lhs_ref[...].reshape(nh, 3 * wc).astype(jnp.bfloat16)
    return jnp.dot(lhs, w_ref[...], preferred_element_type=jnp.float32)


def _conv_block_kernel(*refs, imgs, height, has_shortcut):
    """Fused ConvBlock forward for one block of `imgs` images (all in VMEM)."""
    if has_shortcut:
        (x_ref, ws_ref, w1_ref, w2_ref, w3_ref,
         sc1_ref, sh1_ref, sc2_ref, sh2_ref,
         o_ref, lhs1_ref, lhs2_ref) = refs
    else:
        (x_ref, w1_ref, w2_ref, w3_ref,
         sc1_ref, sh1_ref, sc2_ref, sh2_ref,
         o_ref, lhs1_ref, lhs2_ref) = refs

    x = x_ref[...]                                        # (imgs*H, W*Cin) f32

    # x1 = shortcut(x): 1x1 conv == block-diagonal matmul (kron(I_W, Ws)),
    # skipped statically when Cin == Cout.
    if has_shortcut:
        x1 = jnp.dot(x.astype(jnp.bfloat16), ws_ref[...],
                     preferred_element_type=jnp.float32)
    else:
        x1 = x

    # x2 = BN(ReLU(conv1(x)))   -- pointwise math stays f32 (v5e: no bf16 VPU).
    x2 = _conv3x3_one_matmul(x, lhs1_ref, w1_ref, imgs, height)
    x2 = jnp.maximum(x2, 0.0) * sc1_ref[...] + sh1_ref[...]
    # TODO(synk): Dropout2d is identity in eval mode; training-mode channel
    # dropout (pltpu.prng_*) is intentionally not applied here.

    # x3 = BN(ReLU(conv2(x1 + x2)))
    s12 = x1 + x2
    x3 = _conv3x3_one_matmul(s12, lhs2_ref, w2_ref, imgs, height)
    x3 = jnp.maximum(x3, 0.0) * sc2_ref[...] + sh2_ref[...]

    # out = conv3(x1 + x2 + x3): padding-0 conv computed as a "same" conv so
    # the store is a full lane-dense tile; the wrapper slices the interior.
    o_ref[...] = _conv3x3_one_matmul(s12 + x3, lhs2_ref, w3_ref, imgs, height)


# --------------------------------------------------------------------------
# One-time weight preprocessing (hoisted out of the per-call forward)
# --------------------------------------------------------------------------
def _stacked_band_matrix(w_hwio, width):
    """(3,3,Cin,Cout) HWIO conv weight -> (3*width*Cin, width*Cout) stacked
    banded matrix [T0; T1; T2], where a padding-1 3x3 conv of lane-dense rows
    is  concat(x[i-1], x[i], x[i+1], lanes) @ Wcat.  Missing bands encode the
    zero padding at the left/right image borders."""
    w = w_hwio.astype(jnp.float32)
    blocks = []
    for kh in range(3):
        t = sum(jnp.kron(jnp.eye(width, k=1 - kw, dtype=jnp.float32), w[kh, kw])
                for kw in range(3))
        blocks.append(t)
    return jnp.concatenate(blocks, axis=0)


def prepare_conv_block(params, width):
    """Run ONCE per set of weights; returns kernel-ready arrays."""
    c_out = params["w1"].shape[-1]
    wc_out = width * c_out

    def lane_bcast(v):   # (c_out,) -> (1, width*c_out), lane index = j*c + co
        return jnp.tile(v.astype(jnp.float32), width).reshape(1, wc_out)

    prep = {
        "w1": _stacked_band_matrix(params["w1"], width).astype(jnp.bfloat16),
        "w2": _stacked_band_matrix(params["w2"], width).astype(jnp.bfloat16),
        "w3": _stacked_band_matrix(params["w3"], width).astype(jnp.bfloat16),
        "sc1": lane_bcast(params["scale1"]), "sh1": lane_bcast(params["shift1"]),
        "sc2": lane_bcast(params["scale2"]), "sh2": lane_bcast(params["shift2"]),
        "ws": (jnp.kron(jnp.eye(width, dtype=jnp.float32),
                        params["ws"].astype(jnp.float32)).astype(jnp.bfloat16)
               if params["ws"] is not None else None),
    }
    return prep


# --------------------------------------------------------------------------
# Forward wrapper (jit this; it is lightweight)
# --------------------------------------------------------------------------
def conv_block_forward(x_nchw, prep, *, images_per_block=None):
    n, c_in, h, w = x_nchw.shape
    c_out = prep["w1"].shape[-1] // w
    wc_in, wc_out = w * c_in, w * c_out
    has_shortcut = prep["ws"] is not None

    # NCHW -> lane-dense row layout (n*h, w*c_in), lane index = j*c_in + ci.
    x_rows = jnp.transpose(x_nchw, (0, 2, 3, 1)).astype(jnp.float32)
    x_rows = x_rows.reshape(n * h, wc_in)

    # Row tiling: keep <= ~256 rows (matmul M) per grid step; extra grid steps
    # pipeline and shard across v7x's two TensorCores ("parallel").
    if images_per_block is None:
        images_per_block = max(1, min(n, max(1, 256 // h)))
    nb = images_per_block
    grid = (pl.cdiv(n, nb),)

    row_in = pl.BlockSpec((nb * h, wc_in), lambda i: (i, 0))
    row_out = pl.BlockSpec((nb * h, wc_out), lambda i: (i, 0))

    def resident(a):     # weights/scales stay resident (constant index_map)
        return pl.BlockSpec(a.shape, lambda i: (0,) * a.ndim)

    args, in_specs = [x_rows], [row_in]
    if has_shortcut:
        args.append(prep["ws"])
        in_specs.append(resident(prep["ws"]))
    for name in ("w1", "w2", "w3", "sc1", "sh1", "sc2", "sh2"):
        args.append(prep[name])
        in_specs.append(resident(prep[name]))

    kernel = functools.partial(_conv_block_kernel, imgs=nb, height=h,
                               has_shortcut=has_shortcut)

    out_rows = pl.pallas_call(
        kernel,
        out_shape=jax.ShapeDtypeStruct((n * h, wc_out), jnp.float32),
        grid=grid,
        in_specs=in_specs,
        out_specs=row_out,
        scratch_shapes=[
            pltpu.VMEM((nb, h, 3 * wc_in), jnp.float32),   # conv1 LHS
            pltpu.VMEM((nb, h, 3 * wc_out), jnp.float32),  # conv2/conv3 LHS
        ],
        compiler_params=pltpu.CompilerParams(
            dimension_semantics=("parallel",)),
    )(*args)

    # conv3 was computed as a "same" conv; take the valid interior -> NCHW.
    y = out_rows.reshape(n, h, w, c_out)[:, 1:h - 1, 1:w - 1, :]
    return jnp.transpose(y, (0, 3, 1, 2))


# --------------------------------------------------------------------------
# Pure-JAX reference (for correctness check)
# --------------------------------------------------------------------------
def _ref_conv(x_nhwc, w_hwio, pad, dtype):
    return jax.lax.conv_general_dilated(
        x_nhwc.astype(dtype), w_hwio.astype(dtype), window_strides=(1, 1),
        padding=[(pad, pad), (pad, pad)],
        dimension_numbers=("NHWC", "HWIO", "NHWC"),
        preferred_element_type=jnp.float32)


def conv_block_reference(x_nchw, params, operand_dtype=jnp.float32):
    x = jnp.transpose(x_nchw, (0, 2, 3, 1)).astype(jnp.float32)
    if params["ws"] is not None:
        c_in, c_out = params["ws"].shape
        x1 = _ref_conv(x, params["ws"].reshape(1, 1, c_in, c_out), 0, operand_dtype)
    else:
        x1 = x
    h = jnp.maximum(_ref_conv(x, params["w1"], 1, operand_dtype), 0.0)
    x2 = h * params["scale1"] + params["shift1"]
    h = jnp.maximum(_ref_conv(x1 + x2, params["w2"], 1, operand_dtype), 0.0)
    x3 = h * params["scale2"] + params["shift2"]
    out = _ref_conv(x1 + x2 + x3, params["w3"], 0, operand_dtype)
    return jnp.transpose(out, (0, 3, 1, 2))


# --------------------------------------------------------------------------
# Deterministic parameter construction
# --------------------------------------------------------------------------
def make_params(key, c_in, c_out, eps=1e-5):
    ks = jax.random.split(key, 12)

    def bn_fold(kg, kb, km, kv):
        gamma = 1.0 + 0.1 * jax.random.normal(kg, (c_out,), jnp.float32)
        beta = 0.1 * jax.random.normal(kb, (c_out,), jnp.float32)
        mean = 0.1 * jax.random.normal(km, (c_out,), jnp.float32)
        var = jax.random.uniform(kv, (c_out,), jnp.float32, 0.5, 1.5)
        scale = gamma / jnp.sqrt(var + eps)
        shift = beta - mean * scale
        return scale, shift

    scale1, shift1 = bn_fold(ks[3], ks[4], ks[5], ks[6])
    scale2, shift2 = bn_fold(ks[7], ks[8], ks[9], ks[10])
    return {
        "w1": 0.1 * jax.random.normal(ks[0], (3, 3, c_in, c_out), jnp.float32),
        "w2": 0.1 * jax.random.normal(ks[1], (3, 3, c_out, c_out), jnp.float32),
        "w3": 0.1 * jax.random.normal(ks[2], (3, 3, c_out, c_out), jnp.float32),
        "ws": (0.1 * jax.random.normal(ks[11], (c_in, c_out), jnp.float32)
               if c_in != c_out else None),
        "scale1": scale1, "shift1": shift1,
        "scale2": scale2, "shift2": shift2,
    }


# --------------------------------------------------------------------------
if __name__ == "__main__":
    N, C_IN, C_OUT, H, W = 2, 4, 8, 16, 16
    DROP_OUT = 0.05  # Dropout2d: identity in eval mode (unused).

    key = jax.random.PRNGKey(0)
    k_x, k_p = jax.random.split(key)
    x = jax.random.normal(k_x, (N, C_IN, H, W), jnp.float32)
    params = make_params(k_p, C_IN, C_OUT)

    # One-time weight preprocessing (NOT in the per-call forward path).
    prep = prepare_conv_block(params, W)

    fwd = jax.jit(conv_block_forward)
    out = jax.block_until_ready(fwd(x, prep))
    assert out.shape == (N, C_OUT, H - 2, W - 2), out.shape

    # Primary check: reference with the same bf16 operand quantization
    # (remaining differences are accumulation order only).
    ref_q = conv_block_reference(x, params, operand_dtype=jnp.bfloat16)
    err_q = float(jnp.max(jnp.abs(out - ref_q)))
    assert bool(jnp.allclose(out, ref_q, atol=1e-2, rtol=1e-2)), err_q

    # Sanity check vs the pure-f32 reference (bounded by bf16 operand
    # quantization of the matmul inputs).
    ref_f = conv_block_reference(x, params, operand_dtype=jnp.float32)
    err_f = float(jnp.max(jnp.abs(out - ref_f)))
    assert bool(jnp.allclose(out, ref_f, atol=5e-2, rtol=5e-2)), err_f

    print("KERNEL_OK")
</pallas_src>

<mosaic_0001>
module attributes {stable_mosaic.version = 11 : i64} {
  func.func @_conv_block_kernel(%arg0: i32, %arg1: memref<32x64xf32, #tpu.memory_space<vmem>>, %arg2: memref<64x128xbf16, #tpu.memory_space<vmem>>, %arg3: memref<192x128xbf16, #tpu.memory_space<vmem>>, %arg4: memref<384x128xbf16, #tpu.memory_space<vmem>>, %arg5: memref<384x128xbf16, #tpu.memory_space<vmem>>, %arg6: memref<1x128xf32, #tpu.memory_space<vmem>>, %arg7: memref<1x128xf32, #tpu.memory_space<vmem>>, %arg8: memref<1x128xf32, #tpu.memory_space<vmem>>, %arg9: memref<1x128xf32, #tpu.memory_space<vmem>>, %arg10: memref<32x128xf32, #tpu.memory_space<vmem>>, %arg11: memref<2x16x192xf32, #tpu.memory_space<vmem>>, %arg12: memref<2x16x384xf32, #tpu.memory_space<vmem>>) attributes {dimension_semantics = [#tpu.dimension_semantics<parallel>], iteration_bounds = array<i64: 1>, scalar_prefetch = 0 : i64, scratch_operands = 2 : i64, tpu.core_type = #tpu.core_type<tc>, window_params = [{transform_indices = @transform_0, window_bounds = array<i64: 32, 64>}, {pipeline_mode = #tpu.pipeline_mode<synchronous>, transform_indices = @transform_1, window_bounds = array<i64: 64, 128>}, {pipeline_mode = #tpu.pipeline_mode<synchronous>, transform_indices = @transform_2, window_bounds = array<i64: 192, 128>}, {pipeline_mode = #tpu.pipeline_mode<synchronous>, transform_indices = @transform_3, window_bounds = array<i64: 384, 128>}, {pipeline_mode = #tpu.pipeline_mode<synchronous>, transform_indices = @transform_4, window_bounds = array<i64: 384, 128>}, {pipeline_mode = #tpu.pipeline_mode<synchronous>, transform_indices = @transform_5, window_bounds = array<i64: 1, 128>}, {pipeline_mode = #tpu.pipeline_mode<synchronous>, transform_indices = @transform_6, window_bounds = array<i64: 1, 128>}, {pipeline_mode = #tpu.pipeline_mode<synchronous>, transform_indices = @transform_7, window_bounds = array<i64: 1, 128>}, {pipeline_mode = #tpu.pipeline_mode<synchronous>, transform_indices = @transform_8, window_bounds = array<i64: 1, 128>}, {transform_indices = @transform_9, window_bounds = array<i64: 32, 128>}]} {
    %c0 = arith.constant 0 : index
    %c0_0 = arith.constant 0 : index
    %0 = vector.load %arg1[%c0, %c0_0] : memref<32x64xf32, #tpu.memory_space<vmem>>, vector<32x64xf32>
    %1 = arith.truncf %0 : vector<32x64xf32> to vector<32x64xbf16>
    %c0_1 = arith.constant 0 : index
    %c0_2 = arith.constant 0 : index
    %2 = vector.load %arg2[%c0_1, %c0_2] : memref<64x128xbf16, #tpu.memory_space<vmem>>, vector<64x128xbf16>
    %cst = arith.constant dense<0.000000e+00> : vector<32x128xf32>
    %3 = tpu.matmul %1, %2, %cst {dimension_numbers = #tpu.dot_dimension_numbers<[1], [0], [0], [1], [0, 0, 1, 1], [], []>} : vector<32x64xbf16>, vector<64x128xbf16>, vector<32x128xf32> -> vector<32x128xf32>
    %4 = vector.shape_cast %0 : vector<32x64xf32> to vector<2x16x64xf32>
    %cst_3 = arith.constant 0.000000e+00 : f32
    %5 = vector.broadcast %cst_3 : f32 to vector<2x1x64xf32>
    %c0_4 = arith.constant 0 : index
    %c0_5 = arith.constant 0 : index
    %c0_6 = arith.constant 0 : index
    %6 = vector.load %arg11[%c0_4, %c0_5, %c0_6] : memref<2x16x192xf32, #tpu.memory_space<vmem>>, vector<2x1x64xf32>
    tpu.vector_store %arg11[%c0_4, %c0_5, %c0_6], %5 {strides = array<i32>} : memref<2x16x192xf32, #tpu.memory_space<vmem>>, vector<2x1x64xf32>,
    %7 = vector.extract_strided_slice %4 {offsets = [0, 0, 0], sizes = [2, 15, 64], strides = [1, 1, 1]} : vector<2x16x64xf32> to vector<2x15x64xf32>
    %c0_7 = arith.constant 0 : index
    %c1 = arith.constant 1 : index
    %c0_8 = arith.constant 0 : index
    %8 = vector.load %arg11[%c0_7, %c1, %c0_8] : memref<2x16x192xf32, #tpu.memory_space<vmem>>, vector<2x15x64xf32>
    tpu.vector_store %arg11[%c0_7, %c1, %c0_8], %7 {strides = array<i32>} : memref<2x16x192xf32, #tpu.memory_space<vmem>>, vector<2x15x64xf32>,
    %c0_9 = arith.constant 0 : index
    %c0_10 = arith.constant 0 : index
    %c64 = arith.constant 64 : index
    %9 = vector.load %arg11[%c0_9, %c0_10, %c64] : memref<2x16x192xf32, #tpu.memory_space<vmem>>, vector<2x16x64xf32>
    tpu.vector_store %arg11[%c0_9, %c0_10, %c64], %4 {strides = array<i32>} : memref<2x16x192xf32, #tpu.memory_space<vmem>>, vector<2x16x64xf32>,
    %10 = vector.extract_strided_slice %4 {offsets = [0, 1, 0], sizes = [2, 15, 64], strides = [1, 1, 1]} : vector<2x16x64xf32> to vector<2x15x64xf32>
    %c0_11 = arith.constant 0 : index
    %c0_12 = arith.constant 0 : index
    %c128 = arith.constant 128 : index
    %11 = vector.load %arg11[%c0_11, %c0_12, %c128] : memref<2x16x192xf32, #tpu.memory_space<vmem>>, vector<2x15x64xf32>
    tpu.vector_store %arg11[%c0_11, %c0_12, %c128], %10 {strides = array<i32>} : memref<2x16x192xf32, #tpu.memory_space<vmem>>, vector<2x15x64xf32>,
    %c0_13 = arith.constant 0 : index
    %c15 = arith.constant 15 : index
    %c128_14 = arith.constant 128 : index
    %12 = vector.load %arg11[%c0_13, %c15, %c128_14] : memref<2x16x192xf32, #tpu.memory_space<vmem>>, vector<2x1x64xf32>
    tpu.vector_store %arg11[%c0_13, %c15, %c128_14], %5 {strides = array<i32>} : memref<2x16x192xf32, #tpu.memory_space<vmem>>, vector<2x1x64xf32>,
    %c0_15 = arith.constant 0 : index
    %c0_16 = arith.constant 0 : index
    %c0_17 = arith.constant 0 : index
    %13 = vector.load %arg11[%c0_15, %c0_16, %c0_17] : memref<2x16x192xf32, #tpu.memory_space<vmem>>, vector<2x16x192xf32>
    %14 = vector.shape_cast %13 : vector<2x16x192xf32> to vector<32x192xf32>
    %15 = arith.truncf %14 : vector<32x192xf32> to vector<32x192xbf16>
    %c0_18 = arith.constant 0 : index
    %c0_19 = arith.constant 0 : index
    %16 = vector.load %arg3[%c0_18, %c0_19] : memref<192x128xbf16, #tpu.memory_space<vmem>>, vector<192x128xbf16>
    %cst_20 = arith.constant dense<0.000000e+00> : vector<32x128xf32>
    %17 = tpu.matmul %15, %16, %cst_20 {dimension_numbers = #tpu.dot_dimension_numbers<[1], [0], [0], [1], [0, 0, 1, 1], [], []>} : vector<32x192xbf16>, vector<192x128xbf16>, vector<32x128xf32> -> vector<32x128xf32>
    %cst_21 = arith.constant 0.000000e+00 : f32
    %18 = vector.broadcast %cst_21 : f32 to vector<32x128xf32>
    %19 = arith.maximumf %17, %18 : vector<32x128xf32>
    %c0_22 = arith.constant 0 : index
    %c0_23 = arith.constant 0 : index
    %20 = vector.load %arg6[%c0_22, %c0_23] : memref<1x128xf32, #tpu.memory_space<vmem>>, vector<1x128xf32>
    %21 = vector.broadcast %20 : vector<1x128xf32> to vector<32x128xf32>
    %22 = arith.mulf %19, %21 : vector<32x128xf32>
    %c0_24 = arith.constant 0 : index
    %c0_25 = arith.constant 0 : index
    %23 = vector.load %arg7[%c0_24, %c0_25] : memref<1x128xf32, #tpu.memory_space<vmem>>, vector<1x128xf32>
    %24 = vector.broadcast %23 : vector<1x128xf32> to vector<32x128xf32>
    %25 = arith.addf %22, %24 : vector<32x128xf32>
    %26 = arith.addf %3, %25 : vector<32x128xf32>
    %27 = vector.shape_cast %26 : vector<32x128xf32> to vector<2x16x128xf32>
    %cst_26 = arith.constant 0.000000e+00 : f32
    %28 = vector.broadcast %cst_26 : f32 to vector<2x1x128xf32>
    %c0_27 = arith.constant 0 : index
    %c0_28 = arith.constant 0 : index
    %c0_29 = arith.constant 0 : index
    %29 = vector.load %arg12[%c0_27, %c0_28, %c0_29] : memref<2x16x384xf32, #tpu.memory_space<vmem>>, vector<2x1x128xf32>
    tpu.vector_store %arg12[%c0_27, %c0_28, %c0_29], %28 {strides = array<i32>} : memref<2x16x384xf32, #tpu.memory_space<vmem>>, vector<2x1x128xf32>,
    %30 = vector.extract_strided_slice %27 {offsets = [0, 0, 0], sizes = [2, 15, 128], strides = [1, 1, 1]} : vector<2x16x128xf32> to vector<2x15x128xf32>
    %c0_30 = arith.constant 0 : index
    %c1_31 = arith.constant 1 : index
    %c0_32 = arith.constant 0 : index
    %31 = vector.load %arg12[%c0_30, %c1_31, %c0_32] : memref<2x16x384xf32, #tpu.memory_space<vmem>>, vector<2x15x128xf32>
    tpu.vector_store %arg12[%c0_30, %c1_31, %c0_32], %30 {strides = array<i32>} : memref<2x16x384xf32, #tpu.memory_space<vmem>>, vector<2x15x128xf32>,
    %c0_33 = arith.constant 0 : index
    %c0_34 = arith.constant 0 : index
    %c128_35 = arith.constant 128 : index
    %32 = vector.load %arg12[%c0_33, %c0_34, %c128_35] : memref<2x16x384xf32, #tpu.memory_space<vmem>>, vector<2x16x128xf32>
    tpu.vector_store %arg12[%c0_33, %c0_34, %c128_35], %27 {strides = array<i32>} : memref<2x16x384xf32, #tpu.memory_space<vmem>>, vector<2x16x128xf32>,
    %33 = vector.extract_strided_slice %27 {offsets = [0, 1, 0], sizes = [2, 15, 128], strides = [1, 1, 1]} : vector<2x16x128xf32> to vector<2x15x128xf32>
    %c0_36 = arith.constant 0 : index
    %c0_37 = arith.constant 0 : index
    %c256 = arith.constant 256 : index
    %34 = vector.load %arg12[%c0_36, %c0_37, %c256] : memref<2x16x384xf32, #tpu.memory_space<vmem>>, vector<2x15x128xf32>
    tpu.vector_store %arg12[%c0_36, %c0_37, %c256], %33 {strides = array<i32>} : memref<2x16x384xf32, #tpu.memory_space<vmem>>, vector<2x15x128xf32>,
    %c0_38 = arith.constant 0 : index
    %c15_39 = arith.constant 15 : index
    %c256_40 = arith.constant 256 : index
    %35 = vector.load %arg12[%c0_38, %c15_39, %c256_40] : memref<2x16x384xf32, #tpu.memory_space<vmem>>, vector<2x1x128xf32>
    tpu.vector_store %arg12[%c0_38, %c15_39, %c256_40], %28 {strides = array<i32>} : memref<2x16x384xf32, #tpu.memory_space<vmem>>, vector<2x1x128xf32>,
    %c0_41 = arith.constant 0 : index
    %c0_42 = arith.constant 0 : index
    %c0_43 = arith.constant 0 : index
    %36 = vector.load %arg12[%c0_41, %c0_42, %c0_43] : memref<2x16x384xf32, #tpu.memory_space<vmem>>, vector<2x16x384xf32>
    %37 = vector.shape_cast %36 : vector<2x16x384xf32> to vector<32x384xf32>
    %38 = arith.truncf %37 : vector<32x384xf32> to vector<32x384xbf16>
    %c0_44 = arith.constant 0 : index
    %c0_45 = arith.constant 0 : index
    %39 = vector.load %arg4[%c0_44, %c0_45] : memref<384x128xbf16, #tpu.memory_space<vmem>>, vector<384x128xbf16>
    %cst_46 = arith.constant dense<0.000000e+00> : vector<32x128xf32>
    %40 = tpu.matmul %38, %39, %cst_46 {dimension_numbers = #tpu.dot_dimension_numbers<[1], [0], [0], [1], [0, 0, 1, 1], [], []>} : vector<32x384xbf16>, vector<384x128xbf16>, vector<32x128xf32> -> vector<32x128xf32>
    %cst_47 = arith.constant 0.000000e+00 : f32
    %41 = vector.broadcast %cst_47 : f32 to vector<32x128xf32>
    %42 = arith.maximumf %40, %41 : vector<32x128xf32>
    %c0_48 = arith.constant 0 : index
    %c0_49 = arith.constant 0 : index
    %43 = vector.load %arg8[%c0_48, %c0_49] : memref<1x128xf32, #tpu.memory_space<vmem>>, vector<1x128xf32>
    %44 = vector.broadcast %43 : vector<1x128xf32> to vector<32x128xf32>
    %45 = arith.mulf %42, %44 : vector<32x128xf32>
    %c0_50 = arith.constant 0 : index
    %c0_51 = arith.constant 0 : index
    %46 = vector.load %arg9[%c0_50, %c0_51] : memref<1x128xf32, #tpu.memory_space<vmem>>, vector<1x128xf32>
    %47 = vector.broadcast %46 : vector<1x128xf32> to vector<32x128xf32>
    %48 = arith.addf %45, %47 : vector<32x128xf32>
    %49 = arith.addf %26, %48 : vector<32x128xf32>
    %50 = vector.shape_cast %49 : vector<32x128xf32> to vector<2x16x128xf32>
    %cst_52 = arith.constant 0.000000e+00 : f32
    %51 = vector.broadcast %cst_52 : f32 to vector<2x1x128xf32>
    %c0_53 = arith.constant 0 : index
    %c0_54 = arith.constant 0 : index
    %c0_55 = arith.constant 0 : index
    %52 = vector.load %arg12[%c0_53, %c0_54, %c0_55] : memref<2x16x384xf32, #tpu.memory_space<vmem>>, vector<2x1x128xf32>
    tpu.vector_store %arg12[%c0_53, %c0_54, %c0_55], %51 {strides = array<i32>} : memref<2x16x384xf32, #tpu.memory_space<vmem>>, vector<2x1x128xf32>,
    %53 = vector.extract_strided_slice %50 {offsets = [0, 0, 0], sizes = [2, 15, 128], strides = [1, 1, 1]} : vector<2x16x128xf32> to vector<2x15x128xf32>
    %c0_56 = arith.constant 0 : index
    %c1_57 = arith.constant 1 : index
    %c0_58 = arith.constant 0 : index
    %54 = vector.load %arg12[%c0_56, %c1_57, %c0_58] : memref<2x16x384xf32, #tpu.memory_space<vmem>>, vector<2x15x128xf32>
    tpu.vector_store %arg12[%c0_56, %c1_57, %c0_58], %53 {strides = array<i32>} : memref<2x16x384xf32, #tpu.memory_space<vmem>>, vector<2x15x128xf32>,
    %c0_59 = arith.constant 0 : index
    %c0_60 = arith.constant 0 : index
    %c128_61 = arith.constant 128 : index
    %55 = vector.load %arg12[%c0_59, %c0_60, %c128_61] : memref<2x16x384xf32, #tpu.memory_space<vmem>>, vector<2x16x128xf32>
    tpu.vector_store %arg12[%c0_59, %c0_60, %c128_61], %50 {strides = array<i32>} : memref<2x16x384xf32, #tpu.memory_space<vmem>>, vector<2x16x128xf32>,
    %56 = vector.extract_strided_slice %50 {offsets = [0, 1, 0], sizes = [2, 15, 128], strides = [1, 1, 1]} : vector<2x16x128xf32> to vector<2x15x128xf32>
    %c0_62 = arith.constant 0 : index
    %c0_63 = arith.constant 0 : index
    %c256_64 = arith.constant 256 : index
    %57 = vector.load %arg12[%c0_62, %c0_63, %c256_64] : memref<2x16x384xf32, #tpu.memory_space<vmem>>, vector<2x15x128xf32>
    tpu.vector_store %arg12[%c0_62, %c0_63, %c256_64], %56 {strides = array<i32>} : memref<2x16x384xf32, #tpu.memory_space<vmem>>, vector<2x15x128xf32>,
    %c0_65 = arith.constant 0 : index
    %c15_66 = arith.constant 15 : index
    %c256_67 = arith.constant 256 : index
    %58 = vector.load %arg12[%c0_65, %c15_66, %c256_67] : memref<2x16x384xf32, #tpu.memory_space<vmem>>, vector<2x1x128xf32>
    tpu.vector_store %arg12[%c0_65, %c15_66, %c256_67], %51 {strides = array<i32>} : memref<2x16x384xf32, #tpu.memory_space<vmem>>, vector<2x1x128xf32>,
    %c0_68 = arith.constant 0 : index
    %c0_69 = arith.constant 0 : index
    %c0_70 = arith.constant 0 : index
    %59 = vector.load %arg12[%c0_68, %c0_69, %c0_70] : memref<2x16x384xf32, #tpu.memory_space<vmem>>, vector<2x16x384xf32>
    %60 = vector.shape_cast %59 : vector<2x16x384xf32> to vector<32x384xf32>
    %61 = arith.truncf %60 : vector<32x384xf32> to vector<32x384xbf16>
    %c0_71 = arith.constant 0 : index
    %c0_72 = arith.constant 0 : index
    %62 = vector.load %arg5[%c0_71, %c0_72] : memref<384x128xbf16, #tpu.memory_space<vmem>>, vector<384x128xbf16>
    %cst_73 = arith.constant dense<0.000000e+00> : vector<32x128xf32>
    %63 = tpu.matmul %61, %62, %cst_73 {dimension_numbers = #tpu.dot_dimension_numbers<[1], [0], [0], [1], [0, 0, 1, 1], [], []>} : vector<32x384xbf16>, vector<384x128xbf16>, vector<32x128xf32> -> vector<32x128xf32>
    %c0_74 = arith.constant 0 : index
    %c0_75 = arith.constant 0 : index
    %64 = vector.load %arg10[%c0_74, %c0_75] : memref<32x128xf32, #tpu.memory_space<vmem>>, vector<32x128xf32>
    tpu.vector_store %arg10[%c0_74, %c0_75], %63 {strides = array<i32>} : memref<32x128xf32, #tpu.memory_space<vmem>>, vector<32x128xf32>,
    return
  }
  func.func @transform_0(%arg0: i32) -> (i32, i32) {
    %c0_i32 = arith.constant 0 : i32
    %c0_i32_0 = arith.constant 0 : i32
    return %arg0, %c0_i32 : i32, i32
  }
  func.func @transform_1(%arg0: i32) -> (i32, i32) {
    %c0_i32 = arith.constant 0 : i32
    %c0_i32_0 = arith.constant 0 : i32
    %c0_i32_1 = arith.constant 0 : i32
    return %c0_i32, %c0_i32_0 : i32, i32
  }
  func.func @transform_2(%arg0: i32) -> (i32, i32) {
    %c0_i32 = arith.constant 0 : i32
    %c0_i32_0 = arith.constant 0 : i32
    %c0_i32_1 = arith.constant 0 : i32
    return %c0_i32, %c0_i32_0 : i32, i32
  }
  func.func @transform_3(%arg0: i32) -> (i32, i32) {
    %c0_i32 = arith.constant 0 : i32
    %c0_i32_0 = arith.constant 0 : i32
    %c0_i32_1 = arith.constant 0 : i32
    return %c0_i32, %c0_i32_0 : i32, i32
  }
  func.func @transform_4(%arg0: i32) -> (i32, i32) {
    %c0_i32 = arith.constant 0 : i32
    %c0_i32_0 = arith.constant 0 : i32
    %c0_i32_1 = arith.constant 0 : i32
    return %c0_i32, %c0_i32_0 : i32, i32
  }
  func.func @transform_5(%arg0: i32) -> (i32, i32) {
    %c0_i32 = arith.constant 0 : i32
    %c0_i32_0 = arith.constant 0 : i32
    %c0_i32_1 = arith.constant 0 : i32
    return %c0_i32, %c0_i32_0 : i32, i32
  }
  func.func @transform_6(%arg0: i32) -> (i32, i32) {
    %c0_i32 = arith.constant 0 : i32
    %c0_i32_0 = arith.constant 0 : i32
    %c0_i32_1 = arith.constant 0 : i32
    return %c0_i32, %c0_i32_0 : i32, i32
  }
  func.func @transform_7(%arg0: i32) -> (i32, i32) {
    %c0_i32 = arith.constant 0 : i32
    %c0_i32_0 = arith.constant 0 : i32
    %c0_i32_1 = arith.constant 0 : i32
    return %c0_i32, %c0_i32_0 : i32, i32
  }
  func.func @transform_8(%arg0: i32) -> (i32, i32) {
    %c0_i32 = arith.constant 0 : i32
    %c0_i32_0 = arith.constant 0 : i32
    %c0_i32_1 = arith.constant 0 : i32
    return %c0_i32, %c0_i32_0 : i32, i32
  }
  func.func @transform_9(%arg0: i32) -> (i32, i32) {
    %c0_i32 = arith.constant 0 : i32
    %c0_i32_0 = arith.constant 0 : i32
    return %arg0, %c0_i32 : i32, i32
  }
}

</mosaic_0001>

<bundles_post_ra>
// kernel: conv_block_forward.1
= control target key start
LH: loop header
LB: loop body
LE: loop exit
PB: predicated region body
PF: predicated region fallthrough
CT: control target
= control target key end

     0   :  { %vm67_vm0 = vcmask 523264   ;;  %vm88_vm1 = vcmask 1046528   ;;  %vm100_vm2 = vcmask 522240   ;;  %v1381_v3 = vmov 0   ;;  %s1382_s15 = smov 64   ;;  %s1750_s0 = inlined_call_operand.vmem [shape: f32[32,64], index: 0, kind: input, shape index: {}]   ;;  %s1751_s2 = inlined_call_operand.vmem [shape: bf16[192,128], index: 2, kind: input, shape index: {}]   ;;  %s1752_s1 = inlined_call_operand.vmem [shape: bf16[64,128], index: 1, kind: input, shape index: {}]   ;;  %s1753_s3 = inlined_call_operand.vmem [shape: bf16[384,128], index: 3, kind: input, shape index: {}]   ;;  %s1754_s5 = inlined_call_operand.vmem [shape: f32[1,128], index: 5, kind: input, shape index: {}]   ;;  %s1755_s6 = inlined_call_operand.vmem [shape: f32[1,128], index: 6, kind: input, shape index: {}]   ;;  %s1756_s4 = inlined_call_operand.vmem [shape: bf16[384,128], index: 4, kind: input, shape index: {}]   ;;  %s1757_s7 = inlined_call_operand.vmem [shape: f32[1,128], index: 7, kind: input, shape index: {}]   ;;  %s1758_s8 = inlined_call_operand.vmem [shape: f32[1,128], index: 8, kind: input, shape index: {}]   ;;  %s1759_s9 = inlined_call_operand.vmem [shape: f32[32,128], index: 9, kind: output, shape index: {}]  }
   0x1   :  { %v33_v0 = vld [vmem:[%s1750_s0] sm:$0xff]  ;;  %v1440_v1 = vld [vmem:[%s1750_s0 + $0x10] sm:$0xff]  ;;  %v34_v2 = vld [vmem:[%s1750_s0 + $0x8] sm:$0xff]  ;;  %220 = vmatprep.subr.bf16.mxu0 %v1381_v3  ;;  %vm47_vm3 = vcmask 516096   ;;  %vm65_vm4 = vcmask 523265   ;;  %v1383_v10 = vmov 0.0  }
   0x2   :  { %71 = vrot.lane.b32.xlu0 %v33_v0, %s1382_s15  ;;  %v55_v4 = vrot.slane %v33_v0, 7  ;;  %v89_v5 = vrot.slane %v33_v0, 1  ;;  %75 = vrot.lane.b32.xlu1 %v1440_v1, %s1382_s15  ;;  %v58_v6 = vrot.slane %v1440_v1, 7  ;;  %v92_v7 = vrot.slane %v1440_v1, 1  ;;  %v1454_v8 = vld [vmem:[%s1750_s0 + $0x18] sm:$0xff]  ;;  %v1317_v9 = vld [vmem:[%s1751_s2] sm:$0xff]  }
   0x3   :  { %48 = vst.msk [vmem:[#allocation2] sm:$0x1] %vm47_vm3, %v1383_v10  ;;  %104 = vst.msk [vmem:[#allocation2 + $0x1f] sm:$0x1] %vm47_vm3, %v1383_v10  ;;  %v56_v11 = vrot.slane %v34_v2, 7  ;;  %v90_v12 = vrot.slane %v34_v2, 1  ;;  %221 = vmatpush1.bf16.msra.mxu0 %v1317_v9  ;;  %v37_v15 = vpack.c.bf16 %v34_v2, %v33_v0  ;;  %v38_v36 = vpack.c.bf16 %v1454_v8, %v1440_v1 }
   0x4   :  { %105 = vst.msk [vmem:[#allocation2 + $0x3f] sm:$0x1] %vm47_vm3, %v1383_v10  ;;  %49 = vst.msk [vmem:[#allocation2 + $0x20] sm:$0x1] %vm47_vm3, %v1383_v10  ;;  %v59_v13 = vrot.slane %v1454_v8, 7  ;;  %v93_v14 = vrot.slane %v1454_v8, 1  ;;  %222 = vmatprep.subr.bf16.mxu0 %v1381_v3 }
   0x5   :  { %374 = vst [vmem:[#allocation3] sm:$0x1] %v1383_v10  ;;  %375 = vst [vmem:[#allocation3 + $0x30] sm:$0x1] %v1383_v10  ;;  %v91_v16 = vsel %vm88_vm1, %v89_v5, %v90_v12  ;;  %v1318_v18 = vld [vmem:[%s1751_s2 + $0x8] sm:$0xff]   ;;  %vm54_vm5 = vcmask 1040384   ;;  %1270 = vmatprep.mubr.msk.bf16.mxu1 %vm67_vm0, %v37_v15 }
   0x6   :  { %412 = vst [vmem:[#allocation3 + $0x2f] sm:$0x1] %v1383_v10  ;;  %413 = vst [vmem:[#allocation3 + $0x5f] sm:$0x1] %v1383_v10  ;;  %v94_v17 = vsel %vm88_vm1, %v92_v7, %v93_v14  ;;  %73 = vrot.lane.b32.xlu0 %v34_v2, %s1382_s15  ;;  %77 = vrot.lane.b32.xlu1 %v1454_v8, %s1382_s15  ;;  %v57_v19 = vsel %vm54_vm5, %v55_v4, %v56_v11  ;;  %v1319_v21 = vld [vmem:[%s1751_s2 + $0x10] sm:$0xff]   ;;  %v1320_v22 = vld [vmem:[%s1751_s2 + $0x18] sm:$0xff]  }
   0x7   :  { %66 = vst.msk [vmem:[#allocation2] sm:$0xfe] %vm65_vm4, %v55_v4  ;;  %69 = vst.msk [vmem:[#allocation2 + $0x20] sm:$0xfe] %vm65_vm4, %v58_v6  ;;  %v60_v20 = vsel %vm54_vm5, %v58_v6, %v59_v13  ;;  %223 = vmatpush1.bf16.msra.mxu0 %v1318_v18  ;;  %v1327_v23 = vld [vmem:[%s1752_s1] sm:$0xff]   ;;  %v1329_v25 = vld [vmem:[%s1752_s1 + $0x8] sm:$0xff]  }
   0x8   :  { %101 = vst.msk [vmem:[#allocation2 + $0x18] sm:$0x7f] %vm100_vm2, %v90_v12  ;;  %103 = vst.msk [vmem:[#allocation2 + $0x38] sm:$0x7f] %vm100_vm2, %v93_v14  ;;  %224 = vmatprep.subr.bf16.mxu0 %v1381_v3  ;;  %v1321_v24 = vld [vmem:[%s1751_s2 + $0x20] sm:$0xff]   ;;  %1262 = vmatprep.subr.bf16.mxu1 %v1327_v23  ;;  %v1331_v26 = vld [vmem:[%s1752_s1 + $0x10] sm:$0xff]  }
   0x9   :  { %99 = vst.msk [vmem:[#allocation2 + $0x8] sm:$0xff] %vm67_vm0, %v91_v16  ;;  %102 = vst.msk [vmem:[#allocation2 + $0x28] sm:$0xff] %vm67_vm0, %v94_v17  ;;  %1263 = vmatpush3.bf16.msra.mxu1 %v1327_v23  ;;  %v1322_v29 = vld [vmem:[%s1751_s2 + $0x28] sm:$0xff]   ;;  %v1332_v31 = vld [vmem:[%s1752_s1 + $0x18] sm:$0xff]   ;;  %vm83_vm6 = vcmask 1048064  }
   0xa   :  { %68 = vst.msk [vmem:[#allocation2 + $0x10] sm:$0xff] %vm67_vm0, %v57_v19  ;;  %70 = vst.msk [vmem:[#allocation2 + $0x30] sm:$0xff] %vm67_vm0, %v60_v20  ;;  %1264 = vmatprep.subr.bf16.mxu1 %v1329_v25  ;;  %v1323_v32 = vld [vmem:[%s1751_s2 + $0x30] sm:$0xff]   ;;  %v1333_v33 = vld [vmem:[%s1753_s3 + $0x40] sm:$0xff]  }
   0xb   :  { %225 = vmatpush1.bf16.msra.mxu0 %v1319_v21  ;;  %v1324_v34 = vld [vmem:[%s1751_s2 + $0x38] sm:$0xff]   ;;  %v1334_v35 = vld [vmem:[%s1753_s3] sm:$0xff]   ;;  %v1335_v37 = vld [vmem:[%s1753_s3 + $0x48] sm:$0xff]  }
   0xc   :  { %226 = vmatprep.subr.bf16.mxu0 %v1381_v3  ;;  %v1325_v38 = vld [vmem:[%s1751_s2 + $0x40] sm:$0xff]   ;;  %v1336_v39 = vld [vmem:[%s1753_s3 + $0x8] sm:$0xff]   ;;  %v1328_v41 = vld [vmem:[%s1751_s2 + $0x50] sm:$0xff]  }
   0xd   :  { %1265 = vmatpush3.bf16.msra.mxu1 %v1329_v25  ;;  %v1326_v40 = vld [vmem:[%s1751_s2 + $0x48] sm:$0xff]   ;;  %v1330_v42 = vld [vmem:[%s1751_s2 + $0x58] sm:$0xff]   ;;  %v1337_v56 = vld [vmem:[%s1753_s3 + $0x50] sm:$0xff]  }
   0xe   :  { %1266 = vmatprep.subr.bf16.mxu1 %v1331_v26  ;;  %v1339_v57 = vld [vmem:[%s1753_s3 + $0x10] sm:$0xff]   ;;  %v1338_v58 = vld [vmem:[%s1753_s3 + $0x80] sm:$0xff]   ;;  %v1340_v59 = vld [vmem:[%s1753_s3 + $0x58] sm:$0xff]  }
   0xf   :  { %227 = vmatpush1.bf16.msra.mxu0 %v1320_v22  ;;  %v109_v28 = vld [vmem:[#allocation2 + $0x18] sm:$0xff]  ;;  %v1341_v61 = vld [vmem:[%s1753_s3 + $0x88] sm:$0xff]   ;;  %v1343_v62 = vld [vmem:[%s1753_s3 + $0x60] sm:$0xff]  }
  0x10   :  { %228 = vmatprep.subr.bf16.mxu0 %v1381_v3  ;;  %v107_v27 = vld [vmem:[#allocation2 + $0x8] sm:$0xff]  ;;  %v113_v48 = vld [vmem:[#allocation2 + $0x38] sm:$0xff]  ;;  %v1345_v63 = vld [vmem:[%s1753_s3 + $0x20] sm:$0xff]  }
  0x11   :  { %v115_v30 = vpack.c.bf16 %v109_v28, %v107_v27  ;;  %1267 = vmatpush3.bf16.msra.mxu1 %v1331_v26  ;;  %v111_v47 = vld [vmem:[#allocation2 + $0x28] sm:$0xff]  ;;  %v1342_v60 = vld [vmem:[%s1753_s3 + $0x18] sm:$0xff]   ;;  %v1344_v0 = vld [vmem:[%s1753_s3 + $0x90] sm:$0xff]  }
  0x12   :  { %1268 = vmatprep.subr.bf16.mxu1 %v1332_v31  ;;  %v117_v51 = vpack.c.bf16 %v113_v48, %v111_v47  ;;  %v1346_v1 = vld [vmem:[%s1753_s3 + $0x68] sm:$0xff]   ;;  %v1349_v4 = vld [vmem:[%s1753_s3 + $0x70] sm:$0xff]   ;;  %v1350_v6 = vld [vmem:[%s1753_s3 + $0xa0] sm:$0xff]  }
  0x13   :  { %229 = vmatpush1.bf16.msra.mxu0 %v1321_v24  ;;  %1120 = vmatprep.mubr.msk.bf16.mxu0 %vm67_vm0, %v115_v30  ;;  %v1348_v2 = vld [vmem:[%s1753_s3 + $0x28] sm:$0xff]   ;;  %v1351_v5 = vld [vmem:[%s1753_s3 + $0x30] sm:$0xff]   ;;  %v1352_v7 = vld [vmem:[%s1753_s3 + $0x78] sm:$0xff]  }
  0x14   :  { %230 = vmatprep.subr.bf16.mxu0 %v1381_v3  ;;  %v1354_v8 = vld [vmem:[%s1753_s3 + $0x38] sm:$0xff]   ;;  %v1353_v9 = vld [vmem:[%s1753_s3 + $0xa8] sm:$0xff]   ;;  %v1355_v11 = vld [vmem:[%s1753_s3 + $0xb0] sm:$0xff]  }
  0x15   :  { %1269 = vmatpush3.bf16.msra.mxu1 %v1332_v31  ;;  %v1356_v12 = vld [vmem:[%s1753_s3 + $0xb8] sm:$0xff]   ;;  %v1122_v18 = vld [vmem:[%s1754_s5] ss:$0 sm:$0xff] }
  0x16   :  { %1186 = vmatprep.subr.bf16.mxu1 %v1333_v33  ;;  %v1123_v22 = vld [vmem:[%s1755_s6] ss:$0 sm:$0xff] }
  0x17   :  { %231 = vmatpush1.bf16.msra.mxu0 %v1322_v29 }
  0x18   :  { %232 = vmatprep.subr.bf16.mxu0 %v1381_v3  ;;  %1271 = vmatmul.mubr.msk.bf16.vlgmr.msra.gmra.mrb[0].mxu1 %vm67_vm0, %v38_v36 }
  0x19   :  { %1187 = vmatpush3.bf16.msra.mxu1 %v1334_v35 }
  0x1a   :  { %1188 = vmatprep.subr.bf16.mxu1 %v1335_v37 }
  0x1b   :  { %233 = vmatpush1.bf16.msra.mxu0 %v1323_v32 }
  0x1c   :  { %234 = vmatprep.subr.bf16.mxu0 %v1381_v3 }
  0x1d   :  { %1189 = vmatpush3.bf16.msra.mxu1 %v1336_v39 }
  0x1e   :  { %1190 = vmatprep.subr.bf16.mxu1 %v1337_v56 }
  0x1f   :  { %235 = vmatpush1.bf16.msra.mxu0 %v1324_v34 }
  0x20   :  { %236 = vmatprep.subr.bf16.mxu0 %v1381_v3 }
  0x21   :  { %1191 = vmatpush3.bf16.msra.mxu1 %v1339_v57 }
  0x22   :  { %1192 = vmatprep.subr.bf16.mxu1 %v1340_v59 }
  0x23   :  { %237 = vmatpush1.bf16.msra.mxu0 %v1325_v38 }
  0x24   :  { %238 = vmatprep.subr.bf16.mxu0 %v1381_v3 }
  0x25   :  { %1193 = vmatpush3.bf16.msra.mxu1 %v1342_v60 }
  0x26   :  { %1194 = vmatprep.subr.bf16.mxu1 %v1343_v62 }
  0x27   :  { %239 = vmatpush1.bf16.msra.mxu0 %v1326_v40 }
  0x28   :  { %240 = vmatprep.subr.bf16.mxu0 %v1381_v3 }
  0x29   :  { %1195 = vmatpush3.bf16.msra.mxu1 %v1345_v63 }
  0x2a   :  { %1196 = vmatprep.subr.bf16.mxu1 %v1346_v1  ;;  %v1357_v1 = vld [vmem:[%s1756_s4 + $0x40] sm:$0xff]  }
  0x2b   :  { %241 = vmatpush1.bf16.msra.mxu0 %v1328_v41 }
  0x2c   :  { %242 = vmatprep.subr.bf16.mxu0 %v1381_v3  ;;  %v1347_v3 = vld [vmem:[%s1753_s3 + $0x98] sm:$0xff]  }
  0x2d   :  { %1197 = vmatpush3.bf16.msra.mxu1 %v1348_v2  ;;  %v1358_v2 = vld [vmem:[%s1756_s4] sm:$0xff]  }
  0x2e   :  { %1198 = vmatprep.subr.bf16.mxu1 %v1349_v4  ;;  %v1360_v4 = vld [vmem:[%s1756_s4 + $0x48] sm:$0xff]  }
  0x2f   :  { %243 = vmatpush1.bf16.msra.mxu0 %v1330_v42 }
  0x30   :  { %1274 = vmatprep.subr.bf16.mxu0 %v1338_v58 }
  0x31   :  { %1199 = vmatpush3.bf16.msra.mxu1 %v1351_v5  ;;  %v1362_v5 = vld [vmem:[%s1756_s4 + $0x88] sm:$0xff]  }
  0x32   :  { %1200 = vmatprep.subr.bf16.mxu1 %v1352_v7  ;;  %v1364_v7 = vld [vmem:[%s1756_s4 + $0x10] sm:$0xff]  }
  0x35   :  { %1201 = vmatpush3.bf16.msra.mxu1 %v1354_v8  ;;  %v1365_v8 = vld [vmem:[%s1756_s4 + $0x90] sm:$0xff]  }
  0x36   :  { %1224 = vmatprep.subr.bf16.mxu1 %v1357_v1 }
  0x74   :  { %v72_v43 = vpop.permute.xlu0 %71  ;;  %v76_v44 = vpop.permute.xlu1 %75 }
  0x75   :  { %84 = vst.msk [vmem:[#allocation2] sm:$0xff] %vm83_vm6, %v72_v43  ;;  %86 = vst.msk [vmem:[#allocation2 + $0x20] sm:$0xff] %vm83_vm6, %v76_v44 }
  0x78   :  { %v74_v45 = vpop.permute.xlu0 %73  ;;  %v78_v46 = vpop.permute.xlu1 %77 }
  0x79   :  { %85 = vst.msk [vmem:[#allocation2 + $0x10] sm:$0xff] %vm83_vm6, %v74_v45  ;;  %87 = vst.msk [vmem:[#allocation2 + $0x30] sm:$0xff] %vm83_vm6, %v78_v46 }
  0x7c   :  { %v106_v49 = vld [vmem:[#allocation2] sm:$0xff] }
  0x7d   :  { %v110_v53 = vld [vmem:[#allocation2 + $0x20] sm:$0xff] }
  0x80   :  { %v108_v50 = vld [vmem:[#allocation2 + $0x10] sm:$0xff] }
  0x81   :  { %v114_v52 = vpack.c.bf16 %v108_v50, %v106_v49  ;;  %v112_v54 = vld [vmem:[#allocation2 + $0x30] sm:$0xff] }
  0x82   :  { %v116_v55 = vpack.c.bf16 %v112_v54, %v110_v53 }
  0x83   :  { %253 = vmatmul.mubr.bf16.vlgmr.msra.gmra.mrb[0].mxu0 %v114_v52 }
  0x84   :  { %1121 = vmatprep.mubr.msk.bf16.mxu0 %vm67_vm0, %v117_v51  ;;  %1275 = vmatpush3.bf16.msra.mxu0 %v1338_v58 }
  0x85   :  { %1276 = vmatprep.subr.bf16.mxu0 %v1341_v61 }
  0x88   :  { %1277 = vmatpush3.bf16.msra.mxu0 %v1341_v61 }
  0x89   :  { %1278 = vmatprep.subr.bf16.mxu0 %v1344_v0 }
  0x8b   :  { %261 = vmatmul.mubr.bf16.gmra.mrb[4].mxu0 %v116_v55 }
  0x8c   :  { %1279 = vmatpush3.bf16.msra.mxu0 %v1344_v0 }
  0x8d   :  { %1280 = vmatprep.subr.bf16.mxu0 %v1347_v3 }
  0x90   :  { %1281 = vmatpush3.bf16.msra.mxu0 %v1347_v3  ;;  %v1359_v3 = vld [vmem:[%s1756_s4 + $0x80] sm:$0xff]  }
  0x91   :  { %1282 = vmatprep.subr.bf16.mxu0 %v1350_v6 }
  0x94   :  { %1283 = vmatpush3.bf16.msra.mxu0 %v1350_v6  ;;  %v1363_v6 = vld [vmem:[%s1756_s4 + $0x50] sm:$0xff]  }
  0x95   :  { %1284 = vmatprep.subr.bf16.mxu0 %v1353_v9 }
  0x98   :  { %1285 = vmatpush3.bf16.msra.mxu0 %v1353_v9  ;;  %v1366_v9 = vld [vmem:[%s1756_s4 + $0x58] sm:$0xff]  }
  0x99   :  { %1286 = vmatprep.subr.bf16.mxu0 %v1355_v11 }
  0x9c   :  { %1287 = vmatpush3.bf16.msra.mxu0 %v1355_v11  ;;  %v1367_v11 = vld [vmem:[%s1756_s4 + $0x18] sm:$0xff]  }
  0x9d   :  { %1288 = vmatprep.subr.bf16.mxu0 %v1356_v12 }
  0xa0   :  { %1289 = vmatpush3.bf16.msra.mxu0 %v1356_v12  ;;  %v1368_v12 = vld [vmem:[%s1756_s4 + $0x98] sm:$0xff]  }
  0xa1   :  { %1294 = vmatprep.subr.bf16.mxu0 %v1359_v3 }
  0xeb   :  { %v1272_v13 = vpop.f32.mrb[0].mxu1 }
  0xec   :  { %v359_v14 = vpop.f32.mrb[1].mxu1 }
  0xed   :  { %v1273_v15 = vpop.f32.mrb[2].mxu1 }
  0xee   :  { %v362_v16 = vpop.f32.mrb[3].mxu1 }
 0x156   :  { %v254_v17 = vpop.f32.mrb[0].mxu0 }
 0x157   :  { %v269_v19 = vmax.f32 %v254_v17, 0.0  ;;  %v256_v20 = vpop.f32.mrb[1].mxu0  ;;  %v1373_v17 = vld [vmem:[%s1756_s4 + $0x28] sm:$0xff]  }
 0x158   :  { %v257_v21 = vpop.f32.mrb[2].mxu0  ;;  %v1376_v20 = vld [vmem:[%s1756_s4 + $0x30] sm:$0xff]  }
 0x159   :  { %v280_v23 = vmul.f32 %v1122_v18, %v269_v19  ;;  %v270_v24 = vmax.f32 %v257_v21, 0.0  ;;  %v259_v25 = vpop.f32.mrb[3].mxu0  ;;  %v1375_v19 = vld [vmem:[%s1756_s4 + $0x70] sm:$0xff]  }
 0x15a   :  { %v1377_v21 = vld [vmem:[%s1756_s4 + $0xb0] sm:$0xff]  }
 0x15b   :  { %v281_v26 = vmul.f32 %v1122_v18, %v270_v24  ;;  %v291_v27 = vadd.f32 %v1123_v22, %v280_v23  ;;  %v1379_v23 = vld [vmem:[%s1756_s4 + $0x38] sm:$0xff]  }
 0x15c   :  { %v1380_v24 = vld [vmem:[%s1756_s4 + $0xb8] sm:$0xff]  }
 0x15d   :  { %v1624_v28 = vadd.f32 %v359_v14, %v291_v27  ;;  %v292_v29 = vadd.f32 %v1123_v22, %v281_v26  ;;  %v1370_v14 = vld [vmem:[%s1756_s4 + $0x20] sm:$0xff]  }
 0x15e   :  { %v262_v30 = vpop.f32.mrb[4].mxu0 }
 0x15f   :  { %v380_v31 = vrot.slane %v1624_v28, 7  ;;  %v271_v32 = vmax.f32 %v262_v30, 0.0  ;;  %v1627_v33 = vadd.f32 %v362_v16, %v292_v29  ;;  %v264_v34 = vpop.f32.mrb[5].mxu0  ;;  %v398_v48 = vrot.slane %v1624_v28, 1  ;;  %v1372_v16 = vld [vmem:[%s1756_s4 + $0x68] sm:$0xff]  }
 0x160   :  { %v265_v35 = vpop.f32.mrb[6].mxu0 }
 0x161   :  { %390 = vst [vmem:[#allocation3] sm:$0xfe] %v380_v31  ;;  %v282_v36 = vmul.f32 %v1122_v18, %v271_v32  ;;  %v399_v37 = vrot.slane %v1627_v33, 1  ;;  %v272_v38 = vmax.f32 %v265_v35, 0.0  ;;  %v267_v39 = vpop.f32.mrb[7].mxu0  ;;  %v427_v40 = vpack.c.bf16 %v1627_v33, %v1624_v28 }
 0x162   :  { %v381_v43 = vrot.slane %v1627_v33, 7 }
 0x163   :  { %v293_v41 = vadd.f32 %v1123_v22, %v282_v36  ;;  %409 = vst [vmem:[#allocation3 + $0x28] sm:$0x7f] %v399_v37  ;;  %v283_v42 = vmul.f32 %v1122_v18, %v272_v38  ;;  %656 = vmatprep.mubr.bf16.mxu1 %v427_v40  ;;  %v400_v54 = vsel %vm88_vm1, %v398_v48, %v399_v37  ;;  %v1374_v18 = vld [vmem:[%s1756_s4 + $0xa8] sm:$0xff]  }
 0x164   :  { %v382_v49 = vsel %vm54_vm5, %v380_v31, %v381_v43 }
 0x165   :  { %v1633_v44 = vadd.f32 %v1272_v13, %v293_v41  ;;  %v294_v45 = vadd.f32 %v1123_v22, %v283_v42  ;;  %v1369_v13 = vld [vmem:[%s1756_s4 + $0x60] sm:$0xff]   ;;  %v1378_v22 = vld [vmem:[%s1756_s4 + $0x78] sm:$0xff]  }
 0x167   :  { %v383_v46 = vrot.slane %v1633_v44, 7  ;;  %v1636_v47 = vadd.f32 %v1273_v15, %v294_v45  ;;  %v401_v58 = vrot.slane %v1633_v44, 1  ;;  %v1371_v15 = vld [vmem:[%s1756_s4 + $0xa0] sm:$0xff]  }
 0x168   :  { %v414_v50 = vld [vmem:[#allocation3] sm:$0xff] }
 0x169   :  { %392 = vst [vmem:[#allocation3 + $0x30] sm:$0xfe] %v383_v46  ;;  %v402_v51 = vrot.slane %v1636_v47, 1  ;;  %v426_v52 = vpack.c.bf16 %v382_v49, %v414_v50  ;;  %752 = vst [vmem:[#allocation3] sm:$0x1] %v1383_v10  ;;  %v430_v53 = vpack.c.bf16 %v1636_v47, %v1633_v44  ;;  %v384_v57 = vrot.slane %v1636_v47, 7 }
 0x16a   :  { %v419_v55 = vld [vmem:[#allocation3 + $0x28] sm:$0xff]  ;;  %v1154_v45 = vld [vmem:[%s1757_s7] ss:$0 sm:$0xff] }
 0x16b   :  { %411 = vst [vmem:[#allocation3 + $0x58] sm:$0x7f] %v402_v51  ;;  %657 = vmatmul.mubr.bf16.vlgmr.msra.gmra.mrb[4].mxu1 %v426_v52  ;;  %v428_v56 = vpack.c.bf16 %v419_v55, %v400_v54  ;;  %790 = vst [vmem:[#allocation3 + $0x2f] sm:$0x1] %v1383_v10  ;;  %v385_v59 = vsel %vm54_vm5, %v383_v46, %v384_v57  ;;  %v403_v62 = vsel %vm88_vm1, %v401_v58, %v402_v51  ;;  %v1155_v52 = vld [vmem:[%s1758_s8] ss:$0 sm:$0xff] }
 0x16c   :  { %664 = vmatprep.mubr.bf16.mxu1 %v430_v53  ;;  %1225 = vmatpush3.bf16.msra.mxu1 %v1358_v2 }
 0x16d   :  { %1290 = vmatprep.mubr.bf16.mxu0 %v428_v56  ;;  %1226 = vmatprep.subr.bf16.mxu1 %v1360_v4 }
 0x170   :  { %v420_v60 = vld [vmem:[#allocation3 + $0x30] sm:$0xff] }
 0x171   :  { %v429_v61 = vpack.c.bf16 %v385_v59, %v420_v60  ;;  %753 = vst [vmem:[#allocation3 + $0x30] sm:$0x1] %v1383_v10 }
 0x172   :  { %v425_v63 = vld [vmem:[#allocation3 + $0x58] sm:$0xff] }
 0x173   :  { %665 = vmatmul.mubr.bf16.gmra.mrb[8].mxu1 %v429_v61  ;;  %v431_v0 = vpack.c.bf16 %v425_v63, %v403_v62  ;;  %791 = vst [vmem:[#allocation3 + $0x5f] sm:$0x1] %v1383_v10  ;;  %v1361_v10 = vld [vmem:[%s1756_s4 + $0x8] sm:$0xff]  }
 0x174   :  { %1227 = vmatpush3.bf16.msra.mxu1 %v1361_v10 }
 0x175   :  { %1291 = vmatmul.mubr.bf16.vlgmr.msra.gmra.mrb[8].mxu0 %v431_v0  ;;  %1228 = vmatprep.subr.bf16.mxu1 %v1363_v6 }
 0x176   :  { %1295 = vmatpush3.bf16.msra.mxu0 %v1359_v3 }
 0x177   :  { %1296 = vmatprep.subr.bf16.mxu0 %v1362_v5 }
 0x178   :  { %1229 = vmatpush3.bf16.msra.mxu1 %v1364_v7 }
 0x179   :  { %1230 = vmatprep.subr.bf16.mxu1 %v1366_v9 }
 0x17a   :  { %1297 = vmatpush3.bf16.msra.mxu0 %v1362_v5 }
 0x17b   :  { %1298 = vmatprep.subr.bf16.mxu0 %v1365_v8 }
 0x17c   :  { %1231 = vmatpush3.bf16.msra.mxu1 %v1367_v11 }
 0x17d   :  { %1232 = vmatprep.subr.bf16.mxu1 %v1369_v13 }
 0x17e   :  { %1299 = vmatpush3.bf16.msra.mxu0 %v1365_v8 }
 0x17f   :  { %1300 = vmatprep.subr.bf16.mxu0 %v1368_v12 }
 0x180   :  { %1233 = vmatpush3.bf16.msra.mxu1 %v1370_v14 }
 0x181   :  { %1234 = vmatprep.subr.bf16.mxu1 %v1372_v16 }
 0x182   :  { %1301 = vmatpush3.bf16.msra.mxu0 %v1368_v12 }
 0x183   :  { %1302 = vmatprep.subr.bf16.mxu0 %v1371_v15 }
 0x184   :  { %1235 = vmatpush3.bf16.msra.mxu1 %v1373_v17 }
 0x185   :  { %1236 = vmatprep.subr.bf16.mxu1 %v1375_v19 }
 0x186   :  { %1303 = vmatpush3.bf16.msra.mxu0 %v1371_v15 }
 0x187   :  { %1304 = vmatprep.subr.bf16.mxu0 %v1374_v18 }
 0x188   :  { %1237 = vmatpush3.bf16.msra.mxu1 %v1376_v20 }
 0x189   :  { %1238 = vmatprep.subr.bf16.mxu1 %v1378_v22 }
 0x18a   :  { %1305 = vmatpush3.bf16.msra.mxu0 %v1374_v18 }
 0x18b   :  { %1306 = vmatprep.subr.bf16.mxu0 %v1377_v21 }
 0x18c   :  { %1239 = vmatpush3.bf16.msra.mxu1 %v1379_v23 }
 0x18e   :  { %1307 = vmatpush3.bf16.msra.mxu0 %v1377_v21 }
 0x18f   :  { %1308 = vmatprep.subr.bf16.mxu0 %v1380_v24 }
 0x192   :  { %1309 = vmatpush3.bf16.msra.mxu0 %v1380_v24 }
 0x23e   :  { %v1202_v25 = vpop.f32.mrb[4].mxu1 }
 0x23f   :  { %v1203_v26 = vpop.f32.mrb[5].mxu1 }
 0x240   :  { %v1204_v27 = vadd.f32 %v1203_v26, %v1202_v25  ;;  %v1205_v29 = vpop.f32.mrb[6].mxu1 }
 0x241   :  { %v1206_v30 = vpop.f32.mrb[7].mxu1 }
 0x242   :  { %v1207_v31 = vadd.f32 %v1206_v30, %v1205_v29 }
 0x246   :  { %v1208_v32 = vpop.f32.mrb[8].mxu1 }
 0x247   :  { %v1209_v34 = vpop.f32.mrb[9].mxu1 }
 0x248   :  { %v1292_v35 = vpop.f32.mrb[8].mxu0  ;;  %v1210_v36 = vadd.f32 %v1209_v34, %v1208_v32  ;;  %v1211_v37 = vpop.f32.mrb[10].mxu1 }
 0x249   :  { %v707_v38 = vpop.f32.mrb[9].mxu0  ;;  %v1212_v39 = vpop.f32.mrb[11].mxu1 }
 0x24a   :  { %v716_v40 = vadd.f32 %v1292_v35, %v1210_v36  ;;  %v708_v41 = vadd.f32 %v1204_v27, %v707_v38  ;;  %v1293_v42 = vpop.f32.mrb[10].mxu0  ;;  %v1213_v43 = vadd.f32 %v1212_v39, %v1211_v37 }
 0x24b   :  { %v710_v46 = vpop.f32.mrb[11].mxu0 }
 0x24c   :  { %v724_v48 = vmax.f32 %v716_v40, 0.0  ;;  %v722_v49 = vmax.f32 %v708_v41, 0.0  ;;  %v719_v50 = vadd.f32 %v1293_v42, %v1213_v43  ;;  %v711_v51 = vadd.f32 %v1207_v31, %v710_v46 }
 0x24e   :  { %v735_v53 = vmul.f32 %v1154_v45, %v724_v48  ;;  %v733_v54 = vmul.f32 %v1154_v45, %v722_v49  ;;  %v725_v55 = vmax.f32 %v719_v50, 0.0  ;;  %v723_v56 = vmax.f32 %v711_v51, 0.0 }
 0x250   :  { %v746_v57 = vadd.f32 %v1155_v52, %v735_v53  ;;  %v744_v58 = vadd.f32 %v1155_v52, %v733_v54  ;;  %v736_v59 = vmul.f32 %v1154_v45, %v725_v55  ;;  %v734_v60 = vmul.f32 %v1154_v45, %v723_v56 }
 0x252   :  { %v750_v61 = vadd.f32 %v746_v57, %v1633_v44  ;;  %v748_v62 = vadd.f32 %v744_v58, %v1624_v28  ;;  %v747_v63 = vadd.f32 %v1155_v52, %v736_v59  ;;  %v745_v0 = vadd.f32 %v1155_v52, %v734_v60 }
 0x254   :  { %v761_v1 = vrot.slane %v750_v61, 7  ;;  %v758_v2 = vrot.slane %v748_v62, 7  ;;  %v751_v3 = vadd.f32 %v747_v63, %v1636_v47  ;;  %v749_v4 = vadd.f32 %v745_v0, %v1627_v33 }
 0x255   :  { %v779_v10 = vrot.slane %v750_v61, 1  ;;  %v776_v5 = vrot.slane %v748_v62, 1 }
 0x256   :  { %770 = vst [vmem:[#allocation3 + $0x30] sm:$0xfe] %v761_v1  ;;  %768 = vst [vmem:[#allocation3] sm:$0xfe] %v758_v2  ;;  %v762_v6 = vrot.slane %v751_v3, 7  ;;  %v780_v7 = vrot.slane %v751_v3, 1  ;;  %v805_v11 = vpack.c.bf16 %v749_v4, %v748_v62  ;;  %v808_v44 = vpack.c.bf16 %v751_v3, %v750_v61 }
 0x257   :  { %v759_v8 = vrot.slane %v749_v4, 7  ;;  %v777_v9 = vrot.slane %v749_v4, 1 }
 0x258   :  { %v763_v28 = vsel %vm54_vm5, %v761_v1, %v762_v6  ;;  %v781_v12 = vsel %vm88_vm1, %v779_v10, %v780_v7  ;;  %789 = vst [vmem:[#allocation3 + $0x58] sm:$0x7f] %v780_v7  ;;  %1034 = vmatprep.mubr.bf16.mxu1 %v805_v11 }
 0x259   :  { %v760_v13 = vsel %vm54_vm5, %v758_v2, %v759_v8  ;;  %v778_v47 = vsel %vm88_vm1, %v776_v5, %v777_v9  ;;  %787 = vst [vmem:[#allocation3 + $0x28] sm:$0x7f] %v777_v9 }
 0x25d   :  { %v792_v33 = vld [vmem:[#allocation3] sm:$0xff]  ;;  %v798_v19 = vld [vmem:[#allocation3 + $0x30] sm:$0xff] }
 0x25e   :  { %v804_v14 = vpack.c.bf16 %v760_v13, %v792_v33  ;;  %v807_v20 = vpack.c.bf16 %v763_v28, %v798_v19 }
 0x25f   :  { %v803_v16 = vld [vmem:[#allocation3 + $0x58] sm:$0xff] }
 0x260   :  { %1035 = vmatmul.mubr.bf16.vlgmr.msra.gmra.mrb[12].mxu1 %v804_v14  ;;  %v797_v15 = vld [vmem:[#allocation3 + $0x28] sm:$0xff]  ;;  %v809_v18 = vpack.c.bf16 %v803_v16, %v781_v12 }
 0x261   :  { %v806_v17 = vpack.c.bf16 %v797_v15, %v778_v47  ;;  %1042 = vmatprep.mubr.bf16.mxu1 %v808_v44 }
 0x263   :  { %1310 = vmatprep.mubr.bf16.mxu0 %v806_v17 }
 0x264   :  { %1311 = vmatmul.mubr.bf16.vlgmr.msra.gmra.mrb[12].mxu0 %v809_v18 }
 0x268   :  { %1043 = vmatmul.mubr.bf16.gmra.mrb[16].mxu1 %v807_v20 }
 0x333   :  { %v1240_v21 = vpop.f32.mrb[12].mxu1 }
 0x334   :  { %v1241_v22 = vpop.f32.mrb[13].mxu1 }
 0x335   :  { %v1242_v23 = vadd.f32 %v1241_v22, %v1240_v21  ;;  %v1243_v24 = vpop.f32.mrb[14].mxu1 }
 0x336   :  { %v1244_v25 = vpop.f32.mrb[15].mxu1 }
 0x337   :  { %v1312_v26 = vpop.f32.mrb[12].mxu0  ;;  %v1245_v27 = vadd.f32 %v1244_v25, %v1243_v24 }
 0x338   :  { %v1085_v29 = vpop.f32.mrb[13].mxu0 }
 0x339   :  { %v1086_v30 = vadd.f32 %v1242_v23, %v1085_v29  ;;  %v1313_v31 = vpop.f32.mrb[14].mxu0 }
 0x33a   :  { %v1088_v32 = vpop.f32.mrb[15].mxu0 }
 0x33b   :  { %1100 = vst [vmem:[%s1759_s9] sm:$0xff] %v1086_v30  ;;  %v1089_v34 = vadd.f32 %v1245_v27, %v1088_v32  ;;  %v1246_v35 = vpop.f32.mrb[16].mxu1 }
 0x33c   :  { %v1247_v36 = vpop.f32.mrb[17].mxu1 }
 0x33d   :  { %1101 = vst [vmem:[%s1759_s9 + $0x8] sm:$0xff] %v1089_v34  ;;  %v1248_v37 = vadd.f32 %v1247_v36, %v1246_v35  ;;  %v1249_v38 = vpop.f32.mrb[18].mxu1 }
 0x33e   :  { %v1250_v39 = vpop.f32.mrb[19].mxu1 }
 0x33f   :  { %v1094_v40 = vadd.f32 %v1312_v26, %v1248_v37  ;;  %v1251_v41 = vadd.f32 %v1250_v39, %v1249_v38 }
 0x341   :  { %1102 = vst [vmem:[%s1759_s9 + $0x10] sm:$0xff] %v1094_v40  ;;  %v1097_v42 = vadd.f32 %v1313_v31, %v1251_v41 }
 0x343   :  { %1103 = vst [vmem:[%s1759_s9 + $0x18] sm:$0xff] %v1097_v42 }

</bundles_post_ra>
